<compile_context>
chip_gen: v7x
topology: tpu7x:2x2x1
jax: 0.10.0
libtpu: 0.0.40
codegen_flags: <defaults>
</compile_context>

<pallas_src>
from functools import partial

import jax
import jax.numpy as jnp
from jax.experimental import pallas as pl
from jax.experimental.pallas import tpu as pltpu


NEG_SLOPE = 0.01  # nn.LeakyReLU default

# torch nn.Linear layer shapes, (out_features, in_features):
LAYER_DIMS = ((50, 2), (40, 50), (20, 40), (2, 20))
N_IN = LAYER_DIMS[0][1]     # 2
N_OUT = LAYER_DIMS[-1][0]   # 2


def _pad8(v):
    return -(-v // 8) * 8


K0_PAD = _pad8(N_IN)                                 # 8  (layer-0 contraction pad)
OUT_PADS = tuple(_pad8(o) for o, _ in LAYER_DIMS)    # (56, 40, 24, 8)

_starts = [0]
for _p in OUT_PADS[:-1]:
    _starts.append(_starts[-1] + _p)
# (row_start, row_end, padded contraction dim) per layer inside the packed arrays:
# ((0,56,8), (56,96,56), (96,120,40), (120,128,24))
LAYER_SLICES = tuple(
    (s, s + op, (K0_PAD if li == 0 else OUT_PADS[li - 1]))
    for li, (s, op) in enumerate(zip(_starts, OUT_PADS))
)
PACK_ROWS = sum(OUT_PADS)    # 128 (multiple of 8)
PACK_COLS = 128              # >= max contraction dim (56); lane-tile aligned


def _leaky_relu(x):
    return jnp.where(x > 0, x, NEG_SLOPE * x)


def mlp_kernel(x_ref, wp_ref, bp_ref, o_ref):
    # x_ref : [2, tm]            batch on the lane axis (only the real rows in HBM)
    # wp_ref: [PACK_ROWS, PACK_COLS]  packed padded weights (torch [out, in] layout)
    # bp_ref: [PACK_ROWS, 1]          packed padded biases
    # o_ref : [2, tm]
    tm = x_ref.shape[-1]
    x2 = x_ref[...]                                               # [2, tm]

    # Rebuild the zero-padded [K0_PAD, tm] layer-0 input in VMEM (HBM only carries
    # the 2 real rows).  Pure broadcast + select: cheap VPU work, no relayout.
    row = jax.lax.broadcasted_iota(jnp.int32, (K0_PAD, tm), 0)
    x_row0 = jnp.broadcast_to(x2[0:1, :], (K0_PAD, tm))
    x_row1 = jnp.broadcast_to(x2[1:2, :], (K0_PAD, tm))
    h = jnp.where(row == 0, x_row0, jnp.where(row == 1, x_row1, 0.0))

    n_layers = len(LAYER_SLICES)
    for li, (rs, re, kdim) in enumerate(LAYER_SLICES):
        w = wp_ref[rs:re, 0:kdim]      # [out_pad, k_pad]  static slice
        b = bp_ref[rs:re, :]           # [out_pad, 1] -> broadcasts over lanes
        h = jnp.dot(w, h, preferred_element_type=jnp.float32) + b
        if li < n_layers - 1:
            h = _leaky_relu(h)

    # Only the 2 real output rows go back to HBM.
    o_ref[...] = h[0:N_OUT, :].astype(o_ref.dtype)


def pack_params(params):
    """Pack torch-layout params (w: [out, in], b: [out]) into one padded [128, 128]
    weight array and one [128, 1] bias array.  Pure jnp (jit/tracer safe); call ONCE
    outside the per-call forward path."""
    w_blocks, b_blocks = [], []
    for (w, b), out_pad in zip(params, OUT_PADS):
        w = jnp.asarray(w, jnp.float32)
        b = jnp.asarray(b, jnp.float32)
        out_f, in_f = w.shape
        w_blocks.append(jnp.pad(w, ((0, out_pad - out_f), (0, PACK_COLS - in_f))))
        b_blocks.append(jnp.pad(b, (0, out_pad - out_f))[:, None])
    return jnp.concatenate(w_blocks, axis=0), jnp.concatenate(b_blocks, axis=0)


def _round_up(v, m):
    return -(-v // m) * m


def _choose_tm(n):
    """Batch tile (lane width).  Tiny N: one tile.  Medium N: >=2 grid steps so both
    v7x TensorCores get work.  Large N: big tiles (<=4096) to amortize the ~0.35 us
    per-grid-step overhead while keeping >=4 'parallel' steps."""
    n128 = _round_up(max(n, 1), 128)
    if n128 <= 256:
        return n128
    if n128 <= 2048:
        return _round_up(n128 // 2, 128)
    return min(4096, _round_up(n128 // 4, 128))


@partial(jax.jit, static_argnames=("tm",))
def net_forward(x, wp, bp, *, tm=None):
    """Forward pass of Net via a single Pallas call. x: [N, 2] -> [N, 2]."""
    n, fin = x.shape
    assert fin == N_IN
    if tm is None:
        tm = _choose_tm(n)
    assert tm % 128 == 0
    n_pad = _round_up(n, tm)

    # Transposed input with only the 2 real feature rows in HBM: [2, n_pad].
    # (Under jit this pad/transpose fuses with neighbouring ops.)
    x_t = jnp.zeros((N_IN, n_pad), jnp.float32).at[:, :n].set(x.T.astype(jnp.float32))

    out_t = pl.pallas_call(
        mlp_kernel,
        out_shape=jax.ShapeDtypeStruct((N_OUT, n_pad), jnp.float32),
        grid_spec=pltpu.PrefetchScalarGridSpec(
            num_scalar_prefetch=0,
            grid=(n_pad // tm,),
            in_specs=[
                pl.BlockSpec((N_IN, tm), lambda i: (0, i)),
                # Packed params: constant index_map -> fetched once, VMEM-resident.
                pl.BlockSpec((PACK_ROWS, PACK_COLS), lambda i: (0, 0)),
                pl.BlockSpec((PACK_ROWS, 1), lambda i: (0, 0)),
            ],
            out_specs=pl.BlockSpec((N_OUT, tm), lambda i: (0, i)),
        ),
        compiler_params=pltpu.CompilerParams(
            dimension_semantics=("parallel",)),
    )(x_t, wp, bp)

    return out_t[:, :n].T.astype(x.dtype)


def init_params(key):
    """Deterministic init with torch.nn.Linear shapes: w [out, in], b [out]."""
    params = []
    for (fan_out, fan_in) in LAYER_DIMS:
        key, kw, kb = jax.random.split(key, 3)
        bound = fan_in ** -0.5
        w = jax.random.uniform(kw, (fan_out, fan_in), jnp.float32, -bound, bound)
        b = jax.random.uniform(kb, (fan_out,), jnp.float32, -bound, bound)
        params.append((w, b))
    return params


def reference_forward(x, params):
    h = x.astype(jnp.float32)
    for li, (w, b) in enumerate(params):
        h = h @ w.T + b
        if li < len(params) - 1:
            h = jnp.where(h > 0, h, NEG_SLOPE * h)
    return h


if __name__ == "__main__":
    key = jax.random.PRNGKey(0)
    kp, kx1, kx2 = jax.random.split(key, 3)

    params = init_params(kp)
    wp, bp = pack_params(params)   # pack once, hoisted out of the per-call path

    # Small single-tile batch, plus a non-multiple batch that exercises the
    # multi-step "parallel" grid and the batch-padding path.
    for n, kx in ((64, kx1), (300, kx2)):
        x = jax.random.normal(kx, (n, N_IN), dtype=jnp.float32)
        out = jax.block_until_ready(net_forward(x, wp, bp))
        ref = reference_forward(x, params)
        assert out.shape == (n, N_OUT)
        assert jnp.allclose(out, ref, atol=1e-5, rtol=1e-5), f"mismatch vs reference (N={n})"

    print("KERNEL_OK")
</pallas_src>

<mosaic_0001>
module attributes {stable_mosaic.version = 11 : i64} {
  func.func @mlp_kernel(%arg0: i32, %arg1: memref<2x128xf32, #tpu.memory_space<vmem>>, %arg2: memref<128x128xf32, #tpu.memory_space<vmem>>, %arg3: memref<128x1xf32, #tpu.memory_space<vmem>>, %arg4: memref<2x128xf32, #tpu.memory_space<vmem>>) attributes {dimension_semantics = [#tpu.dimension_semantics<parallel>], iteration_bounds = array<i64: 1>, scalar_prefetch = 0 : i64, scratch_operands = 0 : i64, tpu.core_type = #tpu.core_type<tc>, window_params = [{transform_indices = @transform_0, window_bounds = array<i64: 2, 128>}, {pipeline_mode = #tpu.pipeline_mode<synchronous>, transform_indices = @transform_1, window_bounds = array<i64: 128, 128>}, {pipeline_mode = #tpu.pipeline_mode<synchronous>, transform_indices = @transform_2, window_bounds = array<i64: 128, 1>}, {transform_indices = @transform_3, window_bounds = array<i64: 2, 128>}]} {
    %c0 = arith.constant 0 : index
    %c0_0 = arith.constant 0 : index
    %0 = vector.load %arg1[%c0, %c0_0] : memref<2x128xf32, #tpu.memory_space<vmem>>, vector<2x128xf32>
    %1 = tpu.iota {dimensions = array<i32: 0>} : vector<8x128xi32>
    %2 = vector.extract_strided_slice %0 {offsets = [0, 0], sizes = [1, 128], strides = [1, 1]} : vector<2x128xf32> to vector<1x128xf32>
    %3 = vector.shape_cast %2 : vector<1x128xf32> to vector<1x128xf32>
    %4 = vector.broadcast %3 : vector<1x128xf32> to vector<8x128xf32>
    %5 = vector.extract_strided_slice %0 {offsets = [1, 0], sizes = [1, 128], strides = [1, 1]} : vector<2x128xf32> to vector<1x128xf32>
    %6 = vector.shape_cast %5 : vector<1x128xf32> to vector<1x128xf32>
    %7 = vector.broadcast %6 : vector<1x128xf32> to vector<8x128xf32>
    %c0_i32 = arith.constant 0 : i32
    %8 = vector.broadcast %c0_i32 : i32 to vector<8x128xi32>
    %9 = arith.cmpi eq, %1, %8 : vector<8x128xi32>
    %c1_i32 = arith.constant 1 : i32
    %10 = vector.broadcast %c1_i32 : i32 to vector<8x128xi32>
    %11 = arith.cmpi eq, %1, %10 : vector<8x128xi32>
    %cst = arith.constant 0.000000e+00 : f32
    %12 = vector.broadcast %cst : f32 to vector<8x128xf32>
    %13 = arith.select %11, %7, %12 : vector<8x128xi1>, vector<8x128xf32>
    %14 = arith.select %9, %4, %13 : vector<8x128xi1>, vector<8x128xf32>
    %c0_1 = arith.constant 0 : index
    %c0_2 = arith.constant 0 : index
    %15 = vector.load %arg2[%c0_1, %c0_2] : memref<128x128xf32, #tpu.memory_space<vmem>>, vector<56x8xf32>
    %c0_3 = arith.constant 0 : index
    %c0_4 = arith.constant 0 : index
    %16 = vector.load %arg3[%c0_3, %c0_4] : memref<128x1xf32, #tpu.memory_space<vmem>>, vector<56x1xf32>
    %cst_5 = arith.constant dense<0.000000e+00> : vector<56x128xf32>
    %17 = tpu.matmul %15, %14, %cst_5 {dimension_numbers = #tpu.dot_dimension_numbers<[1], [0], [0], [1], [0, 0, 1, 1], [], []>} : vector<56x8xf32>, vector<8x128xf32>, vector<56x128xf32> -> vector<56x128xf32>
    %18 = vector.broadcast %16 : vector<56x1xf32> to vector<56x128xf32>
    %19 = arith.addf %17, %18 : vector<56x128xf32>
    %cst_6 = arith.constant 0.000000e+00 : f32
    %20 = vector.broadcast %cst_6 : f32 to vector<56x128xf32>
    %21 = arith.cmpf ogt, %19, %20 : vector<56x128xf32>
    %cst_7 = arith.constant 0.00999999977 : f32
    %22 = vector.broadcast %cst_7 : f32 to vector<56x128xf32>
    %23 = arith.mulf %22, %19 : vector<56x128xf32>
    %24 = arith.select %21, %19, %23 : vector<56x128xi1>, vector<56x128xf32>
    %c56 = arith.constant 56 : index
    %c0_8 = arith.constant 0 : index
    %25 = vector.load %arg2[%c56, %c0_8] : memref<128x128xf32, #tpu.memory_space<vmem>>, vector<40x56xf32>
    %c56_9 = arith.constant 56 : index
    %c0_10 = arith.constant 0 : index
    %26 = vector.load %arg3[%c56_9, %c0_10] : memref<128x1xf32, #tpu.memory_space<vmem>>, vector<40x1xf32>
    %cst_11 = arith.constant dense<0.000000e+00> : vector<40x128xf32>
    %27 = tpu.matmul %25, %24, %cst_11 {dimension_numbers = #tpu.dot_dimension_numbers<[1], [0], [0], [1], [0, 0, 1, 1], [], []>} : vector<40x56xf32>, vector<56x128xf32>, vector<40x128xf32> -> vector<40x128xf32>
    %28 = vector.broadcast %26 : vector<40x1xf32> to vector<40x128xf32>
    %29 = arith.addf %27, %28 : vector<40x128xf32>
    %cst_12 = arith.constant 0.000000e+00 : f32
    %30 = vector.broadcast %cst_12 : f32 to vector<40x128xf32>
    %31 = arith.cmpf ogt, %29, %30 : vector<40x128xf32>
    %cst_13 = arith.constant 0.00999999977 : f32
    %32 = vector.broadcast %cst_13 : f32 to vector<40x128xf32>
    %33 = arith.mulf %32, %29 : vector<40x128xf32>
    %34 = arith.select %31, %29, %33 : vector<40x128xi1>, vector<40x128xf32>
    %c96 = arith.constant 96 : index
    %c0_14 = arith.constant 0 : index
    %35 = vector.load %arg2[%c96, %c0_14] : memref<128x128xf32, #tpu.memory_space<vmem>>, vector<24x40xf32>
    %c96_15 = arith.constant 96 : index
    %c0_16 = arith.constant 0 : index
    %36 = vector.load %arg3[%c96_15, %c0_16] : memref<128x1xf32, #tpu.memory_space<vmem>>, vector<24x1xf32>
    %cst_17 = arith.constant dense<0.000000e+00> : vector<24x128xf32>
    %37 = tpu.matmul %35, %34, %cst_17 {dimension_numbers = #tpu.dot_dimension_numbers<[1], [0], [0], [1], [0, 0, 1, 1], [], []>} : vector<24x40xf32>, vector<40x128xf32>, vector<24x128xf32> -> vector<24x128xf32>
    %38 = vector.broadcast %36 : vector<24x1xf32> to vector<24x128xf32>
    %39 = arith.addf %37, %38 : vector<24x128xf32>
    %cst_18 = arith.constant 0.000000e+00 : f32
    %40 = vector.broadcast %cst_18 : f32 to vector<24x128xf32>
    %41 = arith.cmpf ogt, %39, %40 : vector<24x128xf32>
    %cst_19 = arith.constant 0.00999999977 : f32
    %42 = vector.broadcast %cst_19 : f32 to vector<24x128xf32>
    %43 = arith.mulf %42, %39 : vector<24x128xf32>
    %44 = arith.select %41, %39, %43 : vector<24x128xi1>, vector<24x128xf32>
    %c120 = arith.constant 120 : index
    %c0_20 = arith.constant 0 : index
    %45 = vector.load %arg2[%c120, %c0_20] : memref<128x128xf32, #tpu.memory_space<vmem>>, vector<8x24xf32>
    %c120_21 = arith.constant 120 : index
    %c0_22 = arith.constant 0 : index
    %46 = vector.load %arg3[%c120_21, %c0_22] : memref<128x1xf32, #tpu.memory_space<vmem>>, vector<8x1xf32>
    %cst_23 = arith.constant dense<0.000000e+00> : vector<8x128xf32>
    %47 = tpu.matmul %45, %44, %cst_23 {dimension_numbers = #tpu.dot_dimension_numbers<[1], [0], [0], [1], [0, 0, 1, 1], [], []>} : vector<8x24xf32>, vector<24x128xf32>, vector<8x128xf32> -> vector<8x128xf32>
    %48 = vector.broadcast %46 : vector<8x1xf32> to vector<8x128xf32>
    %49 = arith.addf %47, %48 : vector<8x128xf32>
    %50 = vector.extract_strided_slice %49 {offsets = [0, 0], sizes = [2, 128], strides = [1, 1]} : vector<8x128xf32> to vector<2x128xf32>
    %c0_24 = arith.constant 0 : index
    %c0_25 = arith.constant 0 : index
    %51 = vector.load %arg4[%c0_24, %c0_25] : memref<2x128xf32, #tpu.memory_space<vmem>>, vector<2x128xf32>
    tpu.vector_store %arg4[%c0_24, %c0_25], %50 {strides = array<i32>} : memref<2x128xf32, #tpu.memory_space<vmem>>, vector<2x128xf32>,
    return
  }
  func.func @transform_0(%arg0: i32) -> (i32, i32) {
    %c0_i32 = arith.constant 0 : i32
    %c0_i32_0 = arith.constant 0 : i32
    return %c0_i32, %arg0 : i32, i32
  }
  func.func @transform_1(%arg0: i32) -> (i32, i32) {
    %c0_i32 = arith.constant 0 : i32
    %c0_i32_0 = arith.constant 0 : i32
    %c0_i32_1 = arith.constant 0 : i32
    return %c0_i32, %c0_i32_0 : i32, i32
  }
  func.func @transform_2(%arg0: i32) -> (i32, i32) {
    %c0_i32 = arith.constant 0 : i32
    %c0_i32_0 = arith.constant 0 : i32
    %c0_i32_1 = arith.constant 0 : i32
    return %c0_i32, %c0_i32_0 : i32, i32
  }
  func.func @transform_3(%arg0: i32) -> (i32, i32) {
    %c0_i32 = arith.constant 0 : i32
    %c0_i32_0 = arith.constant 0 : i32
    return %c0_i32, %arg0 : i32, i32
  }
}

</mosaic_0001>

<bundles_post_ra>
// kernel: net_forward.1
= control target key start
LH: loop header
LB: loop body
LE: loop exit
PB: predicated region body
PF: predicated region fallthrough
CT: control target
= control target key end

     0   :  { %v15_v0 = vlaneseq  ;;  %v735_v1 = vmov 0.0   ;;  %vm736_vm0 = vmmov 0   ;;  %v737_v3 = vmov 0   ;;  %s915_s0 = inlined_call_operand.vmem [shape: f32[2,128], index: 0, kind: input, shape index: {}]   ;;  %s916_s2 = inlined_call_operand.vmem [shape: f32[128,1], index: 2, kind: input, shape index: {}]   ;;  %s917_s1 = inlined_call_operand.vmem [shape: f32[128,128], index: 1, kind: input, shape index: {}]   ;;  %s918_s3 = inlined_call_operand.vmem [shape: f32[2,128], index: 3, kind: output, shape index: {}]  }
   0x1   :  { %631 = vmatprep.subr.mxu0 %v735_v1  ;;  %633 = vmatprep.mubr.msk.f32.mxu0 %vm736_vm0, %v735_v1  ;;  %v14_v4 = vld [vmem:[%s915_s0] sm:$0x3]  ;;  %v38_v8 = vld [vmem:[%s916_s2 + $0x10] sm:$0xff]  ;;  %v37_v9 = vld [vmem:[%s916_s2 + $0x8] sm:$0xff]  ;;  %vm78_vm3 = vcmask 64512   ;;  %v738_v34 = vmov 0.0|0.0  }
   0x2   :  { %v16_v2 = vshrl.u32 %v15_v0, 7  ;;  %733 = vset.pattern.permute.xlu0 %v737_v3  ;;  %734 = vset.pattern.permute.xlu1 %v737_v3  ;;  %v36_v5 = vld [vmem:[%s916_s2] sm:$0xff]  ;;  %v39_v12 = vld [vmem:[%s916_s2 + $0x18] sm:$0xff]  ;;  %v41_v17 = vld [vmem:[%s916_s2 + $0x28] sm:$0xff]  ;;  %vm256_vm11 = vcmask 457728  }
   0x3   :  { %668 = vmatprep.mubr.msk.f32.mxu1 %vm736_vm0, %v735_v1  ;;  %45 = vperm.xlu0 %733, %v36_v5   ;;  %v29_v14 = vld [vmem:[%s917_s1] sm:$0xff]  ;;  %v30_v18 = vld [vmem:[%s917_s1 + $0x8] sm:$0xff]  ;;  %v42_v19 = vld [vmem:[%s916_s2 + $0x30] sm:$0xff] }
   0x4   :  { %v19_v6 = vsub.s32 0, %v16_v2  ;;  %v23_v7 = vsub.s32 1, %v16_v2  ;;  %vm26_vm1 = vcmp.eq.s32.totalorder %v16_v2, 1  ;;  %55 = vperm.xlu1 %734, %v38_v8   ;;  %vm25_vm2 = vcmp.eq.s32.totalorder %v16_v2, 0  ;;  %v40_v16 = vld [vmem:[%s916_s2 + $0x20] sm:$0xff]  ;;  %v226_v20 = vld [vmem:[%s916_s2 + $0x38] sm:$0xff]  ;;  %711 = vmatprep.subr.bf16.mxu1 %v738_v34 }
   0x5   :  { %v31_v21 = vld [vmem:[%s917_s1 + $0x10] sm:$0xff]  ;;  %v227_v22 = vld [vmem:[%s916_s2 + $0x40] sm:$0xff]  ;;  %v228_v23 = vld [vmem:[%s916_s2 + $0x48] sm:$0xff] }
   0x6   :  { %v20_v10 = vrot.slane %v14_v4, %v19_v6  ;;  %v24_v11 = vrot.slane %v14_v4, %v23_v7  ;;  %v32_v24 = vld [vmem:[%s917_s1 + $0x18] sm:$0xff]  ;;  %v229_v25 = vld [vmem:[%s916_s2 + $0x50] sm:$0xff]  ;;  %v33_v27 = vld [vmem:[%s917_s1 + $0x20] sm:$0xff] }
   0x7   :  { %50 = vperm.xlu0 %733, %v37_v9   ;;  %v230_v26 = vld [vmem:[%s916_s2 + $0x58] sm:$0xff]  ;;  %v380_v28 = vld [vmem:[%s916_s2 + $0x60] sm:$0xff]  ;;  %v381_v29 = vld [vmem:[%s916_s2 + $0x68] sm:$0xff] }
   0x8   :  { %v27_v13 = vsel %vm26_vm1, %v24_v11, 0.0  ;;  %60 = vperm.xlu1 %734, %v39_v12   ;;  %v34_v30 = vld [vmem:[%s917_s1 + $0x28] sm:$0xff]  ;;  %v382_v31 = vld [vmem:[%s916_s2 + $0x70] sm:$0xff]  ;;  %v498_v32 = vld [vmem:[%s916_s2 + $0x78] sm:$0xff] }
   0x9   :  { %v28_v15 = vsel %vm25_vm2, %v20_v10, %v27_v13  ;;  %v35_v33 = vld [vmem:[%s917_s1 + $0x30] sm:$0xff]  ;;  %vm398_vm2 = vcmask 326656  }
   0xa   :  { %632 = vmatpush3.msra.mxu0 %v28_v15 }
   0xb   :  { %634 = vmatmul.mubr.msk.f32.vlgmr.msra.gmra.mrb[0].mxu0 %vm78_vm3, %v29_v14  ;;  %65 = vperm.xlu0 %733, %v40_v16   ;;  %v221_v16 = vld [vmem:[%s917_s1 + $0x38] sm:$0xff] }
   0xc   :  { %636 = vmatprep.mubr.msk.f32.mxu0 %vm736_vm0, %v735_v1  ;;  %70 = vperm.xlu1 %734, %v41_v17  }
   0xd   :  { %720 = vmatprep.subr.bf16.mxu0 %v738_v34 }
   0xf   :  { %637 = vmatmul.mubr.msk.f32.gmra.mrb[2].mxu0 %vm78_vm3, %v30_v18  ;;  %75 = vperm.xlu0 %733, %v42_v19   ;;  %v222_v18 = vld [vmem:[%s917_s1 + $0x40] sm:$0xff]  ;;  %v223_v19 = vld [vmem:[%s917_s1 + $0x48] sm:$0xff] }
  0x10   :  { %639 = vmatprep.mubr.msk.f32.mxu0 %vm736_vm0, %v735_v1  ;;  %233 = vperm.xlu1 %734, %v226_v20   ;;  %v224_v20 = vld [vmem:[%s917_s1 + $0x50] sm:$0xff] }
  0x13   :  { %640 = vmatmul.mubr.msk.f32.gmra.mrb[4].mxu0 %vm78_vm3, %v31_v21  ;;  %238 = vperm.xlu0 %733, %v227_v22   ;;  %v225_v21 = vld [vmem:[%s917_s1 + $0x58] sm:$0xff] }
  0x14   :  { %642 = vmatprep.mubr.msk.f32.mxu0 %vm736_vm0, %v735_v1  ;;  %243 = vperm.xlu1 %734, %v228_v23  }
  0x17   :  { %643 = vmatmul.mubr.msk.f32.gmra.mrb[6].mxu0 %vm78_vm3, %v32_v24  ;;  %248 = vperm.xlu0 %733, %v229_v25  }
  0x18   :  { %645 = vmatprep.mubr.msk.f32.mxu0 %vm736_vm0, %v735_v1  ;;  %253 = vperm.xlu1 %734, %v230_v26  }
  0x1b   :  { %646 = vmatmul.mubr.msk.f32.gmra.mrb[8].mxu0 %vm78_vm3, %v33_v27  ;;  %385 = vperm.xlu0 %733, %v380_v28  }
  0x1c   :  { %648 = vmatprep.mubr.msk.f32.mxu0 %vm736_vm0, %v735_v1  ;;  %390 = vperm.xlu1 %734, %v381_v29  }
  0x1f   :  { %649 = vmatmul.mubr.msk.f32.gmra.mrb[10].mxu0 %vm78_vm3, %v34_v30  ;;  %395 = vperm.xlu0 %733, %v382_v31  }
  0x20   :  { %651 = vmatprep.mubr.msk.f32.mxu0 %vm736_vm0, %v735_v1  ;;  %501 = vperm.xlu1 %734, %v498_v32  }
  0x23   :  { %652 = vmatmul.mubr.msk.f32.gmra.mrb[12].mxu0 %vm78_vm3, %v35_v33 }
  0x24   :  { %693 = vmatprep.mubr.msk.f32.mxu0 %vm736_vm0, %v735_v1 }
  0x82   :  { %v46_v35 = vpop.permute.xlu0 %45 }
  0x83   :  { %v56_v44 = vpop.permute.xlu1 %55 }
  0x86   :  { %v51_v39 = vpop.permute.xlu0 %50 }
  0x87   :  { %v61_v52 = vpop.permute.xlu1 %60 }
  0x8a   :  { %v66_v58 = vpop.permute.xlu0 %65 }
  0x8b   :  { %v71_v2 = vpop.permute.xlu1 %70 }
  0x8e   :  { %v76_v8 = vpop.permute.xlu0 %75 }
  0x8f   :  { %v234_v22 = vpop.permute.xlu1 %233 }
  0x92   :  { %v239_v26 = vpop.permute.xlu0 %238 }
  0x93   :  { %v244_v32 = vpop.permute.xlu1 %243 }
  0xde   :  { %v166_v36 = vpop.f32.mrb[0].mxu0 }
  0xdf   :  { %v167_v37 = vadd.f32 %v166_v36, %v46_v35  ;;  %v635_v38 = vpop.f32.mrb[1].mxu0 }
  0xe1   :  { %v207_v41 = vmul.f32 0.01, %v167_v37  ;;  %vm200_vm4 = vcmp.gt.f32.partialorder %v167_v37, 0.0 }
  0xe2   :  { %v171_v40 = vpop.f32.mrb[2].mxu0 }
  0xe3   :  { %v172_v42 = vadd.f32 %v171_v40, %v51_v39  ;;  %v638_v43 = vpop.f32.mrb[3].mxu0  ;;  %v214_v49 = vsel %vm200_vm4, %v167_v37, %v207_v41  ;;  %v249_v40 = vpop.permute.xlu0 %248 }
  0xe5   :  { %v208_v45 = vmul.f32 0.01, %v172_v42  ;;  %vm201_vm5 = vcmp.gt.f32.partialorder %v172_v42, 0.0 }
  0xe6   :  { %v176_v46 = vpop.f32.mrb[4].mxu0 }
  0xe7   :  { %v177_v47 = vadd.f32 %v176_v46, %v56_v44  ;;  %v641_v48 = vpop.f32.mrb[5].mxu0  ;;  %v215_v50 = vsel %vm201_vm5, %v172_v42, %v208_v45  ;;  %v254_v46 = vpop.permute.xlu1 %253  ;;  %vm504_vm5 = vcmask 195584  }
  0xe8   :  { %v712_v51 = vpack.c.bf16 %v215_v50, %v214_v49 }
  0xe9   :  { %v209_v54 = vmul.f32 0.01, %v177_v47  ;;  %vm202_vm6 = vcmp.gt.f32.partialorder %v177_v47, 0.0 }
  0xea   :  { %v181_v53 = vpop.f32.mrb[6].mxu0  ;;  %713 = vmatpush3.bf16.msra.mxu1 %v712_v51 }
  0xeb   :  { %v182_v55 = vadd.f32 %v181_v53, %v61_v52  ;;  %v644_v56 = vpop.f32.mrb[7].mxu0  ;;  %714 = vmatprep.subr.bf16.mxu1 %v738_v34  ;;  %v216_v62 = vsel %vm202_vm6, %v177_v47, %v209_v54  ;;  %v377_v54 = vld [vmem:[%s917_s1 + $0x60] sm:$0xff] }
  0xec   :  { %v379_v56 = vld [vmem:[%s917_s1 + $0x70] sm:$0xff] }
  0xed   :  { %vm203_vm7 = vcmp.gt.f32.partialorder %v182_v55, 0.0  ;;  %v210_v57 = vmul.f32 0.01, %v182_v55 }
  0xee   :  { %v186_v59 = vpop.f32.mrb[8].mxu0 }
  0xef   :  { %v187_v60 = vadd.f32 %v186_v59, %v66_v58  ;;  %v647_v61 = vpop.f32.mrb[9].mxu0  ;;  %v217_v63 = vsel %vm203_vm7, %v182_v55, %v210_v57  ;;  %v378_v55 = vld [vmem:[%s917_s1 + $0x68] sm:$0xff]  ;;  %v386_v57 = vpop.permute.xlu0 %385 }
  0xf0   :  { %v715_v0 = vpack.c.bf16 %v217_v63, %v216_v62  ;;  %v391_v61 = vpop.permute.xlu1 %390 }
  0xf1   :  { %v211_v4 = vmul.f32 0.01, %v187_v60  ;;  %vm204_vm8 = vcmp.gt.f32.partialorder %v187_v60, 0.0 }
  0xf2   :  { %v191_v3 = vpop.f32.mrb[10].mxu0  ;;  %716 = vmatpush3.bf16.msra.mxu1 %v715_v0 }
  0xf3   :  { %v192_v5 = vadd.f32 %v191_v3, %v71_v2  ;;  %v650_v6 = vpop.f32.mrb[11].mxu0  ;;  %717 = vmatprep.subr.bf16.mxu1 %v738_v34  ;;  %v218_v12 = vsel %vm204_vm8, %v187_v60, %v211_v4  ;;  %v396_v4 = vpop.permute.xlu0 %395 }
  0xf5   :  { %vm205_vm9 = vcmp.gt.f32.partialorder %v192_v5, 0.0  ;;  %v212_v7 = vmul.f32 0.01, %v192_v5 }
  0xf6   :  { %v196_v9 = vpop.f32.mrb[12].mxu0 }
  0xf7   :  { %v197_v10 = vadd.f32 %v196_v9, %v76_v8  ;;  %v653_v11 = vpop.f32.mrb[13].mxu0  ;;  %v219_v13 = vsel %vm205_vm9, %v192_v5, %v212_v7 }
  0xf8   :  { %v718_v14 = vpack.c.bf16 %v219_v13, %v218_v12  ;;  %v497_v12 = vld [vmem:[%s917_s1 + $0x78] sm:$0xff] }
  0xf9   :  { %v213_v15 = vmul.f32 0.01, %v197_v10  ;;  %vm206_vm10 = vcmp.gt.f32.partialorder %v197_v10, 0.0 }
  0xfa   :  { %719 = vmatpush3.bf16.msra.mxu1 %v718_v14  ;;  %v502_v14 = vpop.permute.xlu1 %501 }
  0xfb   :  { %666 = vmatprep.subr.mxu1 %v735_v1  ;;  %v220_v17 = vsel %vm206_vm10, %v197_v10, %v213_v15 }
  0xfe   :  { %667 = vmatpush3.msra.mxu1 %v220_v17 }
  0xff   :  { %669 = vmatmul.mubr.msk.f32.vlgmr.msra.gmra.mrb[0].mxu1 %vm256_vm11, %v221_v16  ;;  %726 = vmatprep.subr.bf16.mxu1 %v738_v34 }
 0x100   :  { %671 = vmatprep.mubr.msk.f32.mxu1 %vm736_vm0, %v735_v1 }
 0x103   :  { %672 = vmatmul.mubr.msk.f32.gmra.mrb[2].mxu1 %vm256_vm11, %v222_v18 }
 0x104   :  { %674 = vmatprep.mubr.msk.f32.mxu1 %vm736_vm0, %v735_v1 }
 0x107   :  { %675 = vmatmul.mubr.msk.f32.gmra.mrb[4].mxu1 %vm256_vm11, %v223_v19 }
 0x108   :  { %677 = vmatprep.mubr.msk.f32.mxu1 %vm736_vm0, %v735_v1 }
 0x10b   :  { %678 = vmatmul.mubr.msk.f32.gmra.mrb[6].mxu1 %vm256_vm11, %v224_v20 }
 0x10c   :  { %680 = vmatprep.mubr.msk.f32.mxu1 %vm736_vm0, %v735_v1 }
 0x10f   :  { %681 = vmatmul.mubr.msk.f32.gmra.mrb[8].mxu1 %vm256_vm11, %v225_v21 }
 0x110   :  { %708 = vmatprep.mubr.msk.f32.mxu1 %vm736_vm0, %v735_v1 }
 0x1d2   :  { %v338_v23 = vpop.f32.mrb[0].mxu1 }
 0x1d3   :  { %v339_v24 = vadd.f32 %v338_v23, %v234_v22  ;;  %v670_v25 = vpop.f32.mrb[1].mxu1 }
 0x1d5   :  { %v367_v28 = vmul.f32 0.01, %v339_v24  ;;  %vm362_vm12 = vcmp.gt.f32.partialorder %v339_v24, 0.0 }
 0x1d6   :  { %v343_v27 = vpop.f32.mrb[2].mxu1 }
 0x1d7   :  { %v344_v29 = vadd.f32 %v343_v27, %v239_v26  ;;  %v673_v30 = vpop.f32.mrb[3].mxu1  ;;  %v372_v35 = vsel %vm362_vm12, %v339_v24, %v367_v28 }
 0x1d9   :  { %vm363_vm13 = vcmp.gt.f32.partialorder %v344_v29, 0.0  ;;  %v368_v31 = vmul.f32 0.01, %v344_v29 }
 0x1da   :  { %v348_v33 = vpop.f32.mrb[4].mxu1 }
 0x1db   :  { %v373_v36 = vsel %vm363_vm13, %v344_v29, %v368_v31  ;;  %v349_v37 = vadd.f32 %v348_v33, %v244_v32  ;;  %v676_v38 = vpop.f32.mrb[5].mxu1 }
 0x1dc   :  { %v721_v39 = vpack.c.bf16 %v373_v36, %v372_v35 }
 0x1dd   :  { %v369_v42 = vmul.f32 0.01, %v349_v37  ;;  %vm364_vm14 = vcmp.gt.f32.partialorder %v349_v37, 0.0 }
 0x1de   :  { %v353_v41 = vpop.f32.mrb[6].mxu1  ;;  %722 = vmatpush3.bf16.msra.mxu0 %v721_v39 }
 0x1df   :  { %v354_v43 = vadd.f32 %v353_v41, %v249_v40  ;;  %v679_v44 = vpop.f32.mrb[7].mxu1  ;;  %723 = vmatprep.subr.bf16.mxu0 %v738_v34  ;;  %v374_v48 = vsel %vm364_vm14, %v349_v37, %v369_v42 }
 0x1e1   :  { %vm365_vm15 = vcmp.gt.f32.partialorder %v354_v43, 0.0  ;;  %v370_v45 = vmul.f32 0.01, %v354_v43 }
 0x1e2   :  { %v358_v47 = vpop.f32.mrb[8].mxu1 }
 0x1e3   :  { %v375_v49 = vsel %vm365_vm15, %v354_v43, %v370_v45  ;;  %v359_v50 = vadd.f32 %v358_v47, %v254_v46  ;;  %v682_v51 = vpop.f32.mrb[9].mxu1 }
 0x1e4   :  { %v724_v52 = vpack.c.bf16 %v375_v49, %v374_v48 }
 0x1e5   :  { %v371_v53 = vmul.f32 0.01, %v359_v50  ;;  %vm366_vm1 = vcmp.gt.f32.partialorder %v359_v50, 0.0 }
 0x1e6   :  { %725 = vmatpush3.bf16.msra.mxu0 %v724_v52 }
 0x1e7   :  { %691 = vmatprep.subr.mxu0 %v735_v1  ;;  %v376_v34 = vsel %vm366_vm1, %v359_v50, %v371_v53 }
 0x1ea   :  { %692 = vmatpush3.msra.mxu0 %v376_v34 }
 0x1eb   :  { %694 = vmatmul.mubr.msk.f32.vlgmr.msra.gmra.mrb[14].mxu0 %vm398_vm2, %v377_v54 }
 0x1ec   :  { %696 = vmatprep.mubr.msk.f32.mxu0 %vm736_vm0, %v735_v1 }
 0x1ef   :  { %697 = vmatmul.mubr.msk.f32.gmra.mrb[16].mxu0 %vm398_vm2, %v378_v55 }
 0x1f0   :  { %699 = vmatprep.mubr.msk.f32.mxu0 %vm736_vm0, %v735_v1 }
 0x1f3   :  { %700 = vmatmul.mubr.msk.f32.gmra.mrb[18].mxu0 %vm398_vm2, %v379_v56 }
 0x2be   :  { %v474_v58 = vpop.f32.mrb[14].mxu0 }
 0x2bf   :  { %v475_v59 = vadd.f32 %v474_v58, %v386_v57  ;;  %v695_v60 = vpop.f32.mrb[15].mxu0 }
 0x2c1   :  { %v491_v63 = vmul.f32 0.01, %v475_v59  ;;  %vm488_vm3 = vcmp.gt.f32.partialorder %v475_v59, 0.0 }
 0x2c2   :  { %v479_v62 = vpop.f32.mrb[16].mxu0 }
 0x2c3   :  { %v480_v0 = vadd.f32 %v479_v62, %v391_v61  ;;  %v698_v2 = vpop.f32.mrb[17].mxu0  ;;  %v494_v6 = vsel %vm488_vm3, %v475_v59, %v491_v63 }
 0x2c5   :  { %vm489_vm4 = vcmp.gt.f32.partialorder %v480_v0, 0.0  ;;  %v492_v3 = vmul.f32 0.01, %v480_v0 }
 0x2c6   :  { %v484_v5 = vpop.f32.mrb[18].mxu0 }
 0x2c7   :  { %v495_v7 = vsel %vm489_vm4, %v480_v0, %v492_v3  ;;  %v485_v8 = vadd.f32 %v484_v5, %v396_v4  ;;  %v701_v9 = vpop.f32.mrb[19].mxu0 }
 0x2c8   :  { %v727_v10 = vpack.c.bf16 %v495_v7, %v494_v6 }
 0x2c9   :  { %v493_v11 = vmul.f32 0.01, %v485_v8  ;;  %vm490_vm0 = vcmp.gt.f32.partialorder %v485_v8, 0.0 }
 0x2ca   :  { %728 = vmatpush3.bf16.msra.mxu1 %v727_v10 }
 0x2cb   :  { %706 = vmatprep.subr.mxu1 %v735_v1  ;;  %v496_v13 = vsel %vm490_vm0, %v485_v8, %v493_v11 }
 0x2ce   :  { %707 = vmatpush3.msra.mxu1 %v496_v13 }
 0x2cf   :  { %709 = vmatmul.mubr.msk.f32.vlgmr.msra.gmra.mrb[10].mxu1 %vm504_vm5, %v497_v12 }
 0x3a2   :  { %v574_v15 = vpop.f32.mrb[10].mxu1 }
 0x3a3   :  { %v575_v16 = vadd.f32 %v574_v15, %v502_v14  ;;  %v710_v17 = vpop.f32.mrb[11].mxu1 }
 0x3a5   :  { %578 = vst [vmem:[%s918_s3] sm:$0x3] %v575_v16 }

</bundles_post_ra>
